<compile_context>
chip_gen: v7x
topology: tpu7x:2x2x1
jax: 0.10.0
libtpu: 0.0.40
codegen_flags: <defaults>
</compile_context>

<pallas_src>
import jax
import jax.numpy as jnp
from jax.experimental import pallas as pl
from jax.experimental.pallas import tpu as pltpu


def _mlp_kernel(x_ref, w1_ref, b1_ref, w2_ref, b2_ref,
                w3_ref, b3_ref, w4_ref, b4_ref, o_ref):
    cdt = w1_ref.dtype  # MXU operand dtype (bf16)

    def layer(h, w_ref, b_ref, relu):
        # h is already bf16 for layer 1 (bf16 streamed input) and f32 afterwards;
        # only the dot operand is cast so bias-add / ReLU stay in f32.
        acc = jnp.dot(h.astype(cdt), w_ref[...],
                      preferred_element_type=jnp.float32)
        acc = acc + b_ref[...].astype(jnp.float32)
        return jnp.maximum(acc, 0.0) if relu else acc

    h = layer(x_ref[...], w1_ref, b1_ref, True)
    h = layer(h, w2_ref, b2_ref, True)
    h = layer(h, w3_ref, b3_ref, True)
    y = layer(h, w4_ref, b4_ref, False)
    o_ref[...] = y.astype(o_ref.dtype)


def _cdiv(a, b):
    return -(-a // b)


def _round_up(a, b):
    return _cdiv(a, b) * b


def _const_spec(shape):
    """Grid-invariant block (weights/biases): fetched once; single-buffered so
    it doesn't double its VMEM footprint (matters on v7x's 64 MiB VMEM)."""
    index_map = lambda i: (0,) * len(shape)
    try:
        return pl.BlockSpec(shape, index_map, pipeline_mode=pl.Buffered(1))
    except TypeError:  # older jax without pipeline_mode kwarg
        return pl.BlockSpec(shape, index_map)


def wav2vec_ds_forward(x, params, *, tm=512, io_dtype=jnp.bfloat16,
                       out_dtype=None):
    """Fused 4-layer MLP forward.

    x: (M, input_dim). params: w1..w4 as (in, out) bf16, b1..b4 as (1, out) f32.
    tm: target rows per grid step (adapted to the batch, see below).
    io_dtype: dtype x is streamed in as (bf16 halves input HBM traffic).
    out_dtype: output dtype (default x.dtype; pass bf16 to halve output traffic).
    """
    M, input_dim = x.shape
    hidden_dim = params["w1"].shape[1]
    out_dtype = x.dtype if out_dtype is None else out_dtype

    # ---- adaptive row tiling -------------------------------------------------
    # Pad the batch only to 8 sublanes, then pick the number of tiles so that
    # (a) each tile is <= the requested target and (b) there are >=2 grid steps
    # whenever the batch allows (v7x megacore). Per-call pad waste < 8*num_tiles.
    m8 = _round_up(max(M, 1), 8)
    num_tiles = _cdiv(m8, tm)
    if m8 >= 16:
        num_tiles = max(num_tiles, 2)
    tm = _round_up(_cdiv(m8, num_tiles), 8)
    Mp = num_tiles * tm

    x_io = x.astype(io_dtype)
    if Mp != M:
        x_io = jnp.pad(x_io, ((0, Mp - M), (0, 0)))

    grid_spec = pltpu.PrefetchScalarGridSpec(
        num_scalar_prefetch=0,
        grid=(num_tiles,),
        in_specs=[
            pl.BlockSpec((tm, input_dim), lambda i: (i, 0)),   # x tile
            _const_spec((input_dim, hidden_dim)),              # w1
            _const_spec((1, hidden_dim)),                      # b1
            _const_spec((hidden_dim, hidden_dim)),             # w2
            _const_spec((1, hidden_dim)),                      # b2
            _const_spec((hidden_dim, hidden_dim)),             # w3
            _const_spec((1, hidden_dim)),                      # b3
            _const_spec((hidden_dim, input_dim)),              # w4
            _const_spec((1, input_dim)),                       # b4
        ],
        out_specs=pl.BlockSpec((tm, input_dim), lambda i: (i, 0)),
    )

    # ---- explicit VMEM budget: real footprint + slack, capped under 64 MiB ---
    io_sz = jnp.dtype(io_dtype).itemsize
    out_sz = jnp.dtype(out_dtype).itemsize
    w_bytes = sum(int(params[k].size) * params[k].dtype.itemsize
                  for k in ("w1", "w2", "w3", "w4"))            # single-buffered
    b_bytes = sum(int(params[k].size) * params[k].dtype.itemsize
                  for k in ("b1", "b2", "b3", "b4"))
    act_bytes = 2 * tm * max(hidden_dim, input_dim) * 4          # f32 temporaries
    footprint = (2 * tm * input_dim * io_sz                      # x double-buffer
                 + 2 * tm * input_dim * out_sz                   # y double-buffer
                 + w_bytes + b_bytes + act_bytes + (2 << 20))    # + slack
    vmem_limit = int(min(max(footprint, 4 << 20), 64 << 20))

    flops = 2 * Mp * 2 * (input_dim * hidden_dim + hidden_dim * hidden_dim)
    bytes_accessed = Mp * input_dim * (io_sz + out_sz) + w_bytes + b_bytes
    cost = pl.CostEstimate(flops=flops, transcendentals=0,
                           bytes_accessed=bytes_accessed)

    y = pl.pallas_call(
        _mlp_kernel,
        out_shape=jax.ShapeDtypeStruct((Mp, input_dim), out_dtype),
        grid_spec=grid_spec,
        compiler_params=pltpu.CompilerParams(
            dimension_semantics=("parallel",),
            vmem_limit_bytes=vmem_limit),
        cost_estimate=cost,
    )(x_io, params["w1"], params["b1"], params["w2"], params["b2"],
      params["w3"], params["b3"], params["w4"], params["b4"])

    return y if Mp == M else y[:M]


def init_params(key, input_dim, hidden_dim, *, weight_dtype=jnp.bfloat16):
    """Deterministic synthetic weights (nn.Linear init, stored transposed).

    Weights in `weight_dtype` (bf16 feeds the MXU at native rate); biases f32.
    NOTE: bf16 weights introduce quantization error vs a true f32 PyTorch model;
    pass weight_dtype=jnp.float32 if bit-accuracy vs the original matters.
    """
    ks = jax.random.split(key, 8)

    def lin(kw, kb, fan_in, fan_out):
        bound = 1.0 / jnp.sqrt(fan_in)
        w = jax.random.uniform(kw, (fan_in, fan_out), jnp.float32, -bound, bound)
        b = jax.random.uniform(kb, (1, fan_out), jnp.float32, -bound, bound)
        return w.astype(weight_dtype), b

    w1, b1 = lin(ks[0], ks[1], input_dim, hidden_dim)
    w2, b2 = lin(ks[2], ks[3], hidden_dim, hidden_dim)
    w3, b3 = lin(ks[4], ks[5], hidden_dim, hidden_dim)
    w4, b4 = lin(ks[6], ks[7], hidden_dim, input_dim)
    return dict(w1=w1, b1=b1, w2=w2, b2=b2, w3=w3, b3=b3, w4=w4, b4=b4)


def reference_forward(x, p, *, io_dtype=jnp.bfloat16):
    """Pure-JAX reference with identical compute dtypes (bf16 operands, f32 acc)."""
    cdt = p["w1"].dtype
    h = x.astype(io_dtype)
    for wk, bk, relu in (("w1", "b1", True), ("w2", "b2", True),
                         ("w3", "b3", True), ("w4", "b4", False)):
        h = jnp.dot(h.astype(cdt), p[wk],
                    preferred_element_type=jnp.float32) + p[bk]
        if relu:
            h = jnp.maximum(h, 0.0)
    return h.astype(x.dtype)


if __name__ == "__main__":
    input_dim = 128    # wav2vec feature dim (lane-aligned)
    hidden_dim = 128
    batch = 16

    key = jax.random.PRNGKey(0)
    kx, kp = jax.random.split(key)
    x = jax.random.normal(kx, (batch, input_dim), jnp.float32)
    params = init_params(kp, input_dim, hidden_dim)

    y = wav2vec_ds_forward(x, params)
    y = jax.block_until_ready(y)

    y_ref = reference_forward(x, params)
    assert y.shape == (batch, input_dim)
    assert y.dtype == x.dtype
    assert jnp.allclose(y, y_ref, atol=2e-2, rtol=2e-2), (
        float(jnp.max(jnp.abs(y - y_ref))))

    print("KERNEL_OK")
</pallas_src>

<mosaic_0001>
module attributes {stable_mosaic.version = 11 : i64} {
  func.func @_mlp_kernel(%arg0: i32, %arg1: memref<8x128xbf16, #tpu.memory_space<vmem>>, %arg2: memref<128x128xbf16, #tpu.memory_space<vmem>>, %arg3: memref<1x128xf32, #tpu.memory_space<vmem>>, %arg4: memref<128x128xbf16, #tpu.memory_space<vmem>>, %arg5: memref<1x128xf32, #tpu.memory_space<vmem>>, %arg6: memref<128x128xbf16, #tpu.memory_space<vmem>>, %arg7: memref<1x128xf32, #tpu.memory_space<vmem>>, %arg8: memref<128x128xbf16, #tpu.memory_space<vmem>>, %arg9: memref<1x128xf32, #tpu.memory_space<vmem>>, %arg10: memref<8x128xf32, #tpu.memory_space<vmem>>) attributes {dimension_semantics = [#tpu.dimension_semantics<parallel>], iteration_bounds = array<i64: 2>, scalar_prefetch = 0 : i64, scratch_operands = 0 : i64, tpu.core_type = #tpu.core_type<tc>, window_params = [{transform_indices = @transform_0, window_bounds = array<i64: 8, 128>}, {pipeline_mode = #tpu.pipeline_mode<synchronous>, transform_indices = @transform_1, window_bounds = array<i64: 128, 128>}, {pipeline_mode = #tpu.pipeline_mode<synchronous>, transform_indices = @transform_2, window_bounds = array<i64: 1, 128>}, {pipeline_mode = #tpu.pipeline_mode<synchronous>, transform_indices = @transform_3, window_bounds = array<i64: 128, 128>}, {pipeline_mode = #tpu.pipeline_mode<synchronous>, transform_indices = @transform_4, window_bounds = array<i64: 1, 128>}, {pipeline_mode = #tpu.pipeline_mode<synchronous>, transform_indices = @transform_5, window_bounds = array<i64: 128, 128>}, {pipeline_mode = #tpu.pipeline_mode<synchronous>, transform_indices = @transform_6, window_bounds = array<i64: 1, 128>}, {pipeline_mode = #tpu.pipeline_mode<synchronous>, transform_indices = @transform_7, window_bounds = array<i64: 128, 128>}, {pipeline_mode = #tpu.pipeline_mode<synchronous>, transform_indices = @transform_8, window_bounds = array<i64: 1, 128>}, {transform_indices = @transform_9, window_bounds = array<i64: 8, 128>}]} {
    %c0 = arith.constant 0 : index
    %c0_0 = arith.constant 0 : index
    %0 = vector.load %arg1[%c0, %c0_0] : memref<8x128xbf16, #tpu.memory_space<vmem>>, vector<8x128xbf16>
    %c0_1 = arith.constant 0 : index
    %c0_2 = arith.constant 0 : index
    %1 = vector.load %arg2[%c0_1, %c0_2] : memref<128x128xbf16, #tpu.memory_space<vmem>>, vector<128x128xbf16>
    %cst = arith.constant dense<0.000000e+00> : vector<8x128xf32>
    %2 = tpu.matmul %0, %1, %cst {dimension_numbers = #tpu.dot_dimension_numbers<[1], [0], [0], [1], [0, 0, 1, 1], [], []>} : vector<8x128xbf16>, vector<128x128xbf16>, vector<8x128xf32> -> vector<8x128xf32>
    %c0_3 = arith.constant 0 : index
    %c0_4 = arith.constant 0 : index
    %3 = vector.load %arg3[%c0_3, %c0_4] : memref<1x128xf32, #tpu.memory_space<vmem>>, vector<1x128xf32>
    %4 = vector.broadcast %3 : vector<1x128xf32> to vector<8x128xf32>
    %5 = arith.addf %2, %4 : vector<8x128xf32>
    %cst_5 = arith.constant 0.000000e+00 : f32
    %6 = vector.broadcast %cst_5 : f32 to vector<8x128xf32>
    %7 = arith.maximumf %5, %6 : vector<8x128xf32>
    %8 = arith.truncf %7 : vector<8x128xf32> to vector<8x128xbf16>
    %c0_6 = arith.constant 0 : index
    %c0_7 = arith.constant 0 : index
    %9 = vector.load %arg4[%c0_6, %c0_7] : memref<128x128xbf16, #tpu.memory_space<vmem>>, vector<128x128xbf16>
    %cst_8 = arith.constant dense<0.000000e+00> : vector<8x128xf32>
    %10 = tpu.matmul %8, %9, %cst_8 {dimension_numbers = #tpu.dot_dimension_numbers<[1], [0], [0], [1], [0, 0, 1, 1], [], []>} : vector<8x128xbf16>, vector<128x128xbf16>, vector<8x128xf32> -> vector<8x128xf32>
    %c0_9 = arith.constant 0 : index
    %c0_10 = arith.constant 0 : index
    %11 = vector.load %arg5[%c0_9, %c0_10] : memref<1x128xf32, #tpu.memory_space<vmem>>, vector<1x128xf32>
    %12 = vector.broadcast %11 : vector<1x128xf32> to vector<8x128xf32>
    %13 = arith.addf %10, %12 : vector<8x128xf32>
    %cst_11 = arith.constant 0.000000e+00 : f32
    %14 = vector.broadcast %cst_11 : f32 to vector<8x128xf32>
    %15 = arith.maximumf %13, %14 : vector<8x128xf32>
    %16 = arith.truncf %15 : vector<8x128xf32> to vector<8x128xbf16>
    %c0_12 = arith.constant 0 : index
    %c0_13 = arith.constant 0 : index
    %17 = vector.load %arg6[%c0_12, %c0_13] : memref<128x128xbf16, #tpu.memory_space<vmem>>, vector<128x128xbf16>
    %cst_14 = arith.constant dense<0.000000e+00> : vector<8x128xf32>
    %18 = tpu.matmul %16, %17, %cst_14 {dimension_numbers = #tpu.dot_dimension_numbers<[1], [0], [0], [1], [0, 0, 1, 1], [], []>} : vector<8x128xbf16>, vector<128x128xbf16>, vector<8x128xf32> -> vector<8x128xf32>
    %c0_15 = arith.constant 0 : index
    %c0_16 = arith.constant 0 : index
    %19 = vector.load %arg7[%c0_15, %c0_16] : memref<1x128xf32, #tpu.memory_space<vmem>>, vector<1x128xf32>
    %20 = vector.broadcast %19 : vector<1x128xf32> to vector<8x128xf32>
    %21 = arith.addf %18, %20 : vector<8x128xf32>
    %cst_17 = arith.constant 0.000000e+00 : f32
    %22 = vector.broadcast %cst_17 : f32 to vector<8x128xf32>
    %23 = arith.maximumf %21, %22 : vector<8x128xf32>
    %24 = arith.truncf %23 : vector<8x128xf32> to vector<8x128xbf16>
    %c0_18 = arith.constant 0 : index
    %c0_19 = arith.constant 0 : index
    %25 = vector.load %arg8[%c0_18, %c0_19] : memref<128x128xbf16, #tpu.memory_space<vmem>>, vector<128x128xbf16>
    %cst_20 = arith.constant dense<0.000000e+00> : vector<8x128xf32>
    %26 = tpu.matmul %24, %25, %cst_20 {dimension_numbers = #tpu.dot_dimension_numbers<[1], [0], [0], [1], [0, 0, 1, 1], [], []>} : vector<8x128xbf16>, vector<128x128xbf16>, vector<8x128xf32> -> vector<8x128xf32>
    %c0_21 = arith.constant 0 : index
    %c0_22 = arith.constant 0 : index
    %27 = vector.load %arg9[%c0_21, %c0_22] : memref<1x128xf32, #tpu.memory_space<vmem>>, vector<1x128xf32>
    %28 = vector.broadcast %27 : vector<1x128xf32> to vector<8x128xf32>
    %29 = arith.addf %26, %28 : vector<8x128xf32>
    %c0_23 = arith.constant 0 : index
    %c0_24 = arith.constant 0 : index
    %30 = vector.load %arg10[%c0_23, %c0_24] : memref<8x128xf32, #tpu.memory_space<vmem>>, vector<8x128xf32>
    tpu.vector_store %arg10[%c0_23, %c0_24], %29 {strides = array<i32>} : memref<8x128xf32, #tpu.memory_space<vmem>>, vector<8x128xf32>,
    return
  }
  func.func @transform_0(%arg0: i32) -> (i32, i32) {
    %c0_i32 = arith.constant 0 : i32
    %c0_i32_0 = arith.constant 0 : i32
    return %arg0, %c0_i32 : i32, i32
  }
  func.func @transform_1(%arg0: i32) -> (i32, i32) {
    %c0_i32 = arith.constant 0 : i32
    %c0_i32_0 = arith.constant 0 : i32
    %c0_i32_1 = arith.constant 0 : i32
    return %c0_i32, %c0_i32_0 : i32, i32
  }
  func.func @transform_2(%arg0: i32) -> (i32, i32) {
    %c0_i32 = arith.constant 0 : i32
    %c0_i32_0 = arith.constant 0 : i32
    %c0_i32_1 = arith.constant 0 : i32
    return %c0_i32, %c0_i32_0 : i32, i32
  }
  func.func @transform_3(%arg0: i32) -> (i32, i32) {
    %c0_i32 = arith.constant 0 : i32
    %c0_i32_0 = arith.constant 0 : i32
    %c0_i32_1 = arith.constant 0 : i32
    return %c0_i32, %c0_i32_0 : i32, i32
  }
  func.func @transform_4(%arg0: i32) -> (i32, i32) {
    %c0_i32 = arith.constant 0 : i32
    %c0_i32_0 = arith.constant 0 : i32
    %c0_i32_1 = arith.constant 0 : i32
    return %c0_i32, %c0_i32_0 : i32, i32
  }
  func.func @transform_5(%arg0: i32) -> (i32, i32) {
    %c0_i32 = arith.constant 0 : i32
    %c0_i32_0 = arith.constant 0 : i32
    %c0_i32_1 = arith.constant 0 : i32
    return %c0_i32, %c0_i32_0 : i32, i32
  }
  func.func @transform_6(%arg0: i32) -> (i32, i32) {
    %c0_i32 = arith.constant 0 : i32
    %c0_i32_0 = arith.constant 0 : i32
    %c0_i32_1 = arith.constant 0 : i32
    return %c0_i32, %c0_i32_0 : i32, i32
  }
  func.func @transform_7(%arg0: i32) -> (i32, i32) {
    %c0_i32 = arith.constant 0 : i32
    %c0_i32_0 = arith.constant 0 : i32
    %c0_i32_1 = arith.constant 0 : i32
    return %c0_i32, %c0_i32_0 : i32, i32
  }
  func.func @transform_8(%arg0: i32) -> (i32, i32) {
    %c0_i32 = arith.constant 0 : i32
    %c0_i32_0 = arith.constant 0 : i32
    %c0_i32_1 = arith.constant 0 : i32
    return %c0_i32, %c0_i32_0 : i32, i32
  }
  func.func @transform_9(%arg0: i32) -> (i32, i32) {
    %c0_i32 = arith.constant 0 : i32
    %c0_i32_0 = arith.constant 0 : i32
    return %arg0, %c0_i32 : i32, i32
  }
}

</mosaic_0001>

<bundles_post_ra>
// kernel: tpu_custom_call.1
= control target key start
LH: loop header
LB: loop body
LE: loop exit
PB: predicated region body
PF: predicated region fallthrough
CT: control target
= control target key end

     0   :  { %s1902_s0 = inlined_call_operand.hbm [shape: bf16[16,128], index: 0, kind: input, shape index: {}]   ;;  %s1903_s1 = inlined_call_operand.hbm [shape: bf16[128,128], index: 1, kind: input, shape index: {}]   ;;  %s1904_s2 = inlined_call_operand.vmem [shape: f32[1,128], index: 2, kind: input, shape index: {}]   ;;  %s1905_s3 = inlined_call_operand.hbm [shape: bf16[128,128], index: 3, kind: input, shape index: {}]   ;;  %s1906_s4 = inlined_call_operand.vmem [shape: f32[1,128], index: 4, kind: input, shape index: {}]   ;;  %s1907_s5 = inlined_call_operand.hbm [shape: bf16[128,128], index: 5, kind: input, shape index: {}]   ;;  %s1908_s6 = inlined_call_operand.vmem [shape: f32[1,128], index: 6, kind: input, shape index: {}]   ;;  %s1909_s7 = inlined_call_operand.hbm [shape: bf16[128,128], index: 7, kind: input, shape index: {}]   ;;  %s1910_s8 = inlined_call_operand.vmem [shape: f32[1,128], index: 8, kind: input, shape index: {}]   ;;  %s1911_s9 = inlined_call_operand.hbm [shape: f32[16,128], index: 9, kind: output, shape index: {}]  }
   0x1   :  { %1916 = sst [smem:[#allocation16_spill]] %s1903_s1 }
   0x2   :  { %1917 = sst [smem:[#allocation17_spill]] %s1911_s9 }
   0x3   :  { %14 = vsyncpa [#allocation3], 0 }
   0x4   :  { %16 = vsyncpa [#allocation3 + $0x1], 0 }
   0x5   :  { %17 = vsyncpa [#allocation6], 0 }
   0x6   :  { %18 = vsyncpa [#allocation9], 0 }
   0x7   :  { %19 = vsyncpa [#allocation4], 0 }
   0x8   :  { %21 = vsyncpa [#allocation4 + $0x1], 0  ;;  %s1554_s30 = smov 0   ;;  %s1556_s10 = smov 0  }
   0x9   :  { %s1558_s11 = smov 0   ;;  %s1560_s12 = smov 0  }
   0xa LB: > { %s1494_s13 = smov [#allocation5]   ;;  %s1575_s15 = sadd.s32 4294967295, %s1492_s12   ;;  %s1492_s12 = sphi %s1560_s12, %s1940_s12   ;;  %s1488_s11 = sphi %s1558_s11, %s1939_s11   ;;  %s1484_s10 = sphi %s1556_s10, %s1938_s10   ;;  %s1480_s30 = sphi %s1554_s30, %s1937_s30  }
   0xb   : > { %s264_s14 = sshll.u32 %s1494_s13, 4  ;;  %p982_p0 = scmp.ge.s32.totalorder %s1492_s12, 1  ;;  %s1580_s14 = int_to_ptr.vmem [resolvable:$true] %s264_s14 }
   0xc   : > { %p1913_p1 = scmp.eq.s32.totalorder %s1575_s15, 0  ;;  %p252_p2 = scmp.lt.s32.totalorder %s1492_s12, 3 }
   0xd   : > { %s1495_s17 = smov [#allocation8]   ;;  %s1496_s20 = smov [#allocation7]  }
   0xe   : > { %p1582_p3 = pnand %p982_p0, %p252_p2  ;;  %s296_s18 = sshll.u32 %s1495_s17, 4  ;;  %s1595_s18 = int_to_ptr.vmem [resolvable:$true] %s296_s18 }
   0xf   : > { %s280_s21 = sshll.u32 %s1496_s20, 4  ;;  %s1920_s1 = sld [smem:[#allocation16_spill]]  ;;  %s1597_s21 = int_to_ptr.vmem [resolvable:$true] %s280_s21 }
  0x10   : > { %s1918_s16 = scalar_select %p1582_p3, 1, 0 }
  0x11   : > { %p1173_p5 = pneg %p1582_p3 }
  0x13   : > { %p1591_p6 = pnand %p1173_p5, %p1913_p1 }
  0x15   : > { %s1276_s24 = scalar_lea.hbm %s1920_s1, 1024  ;;  %p1607_p8 = pneg %p1591_p6 }
  0x16   : > { %p1277_p7 = scmp.ne.s32.totalorder %s1920_s1, %s1276_s24  ;;  %p1283_p11 = scmp.lt.u32.totalorder %s1276_s24, %s1920_s1 }
  0x18   : > { %p1279_p9 = pnand %p1607_p8, %p1277_p7 }
  0x1a   : > { %p1280_p10 = pneg %p1279_p9 }
  0x1c   : > { %p1285_p12 = pnand %p1283_p11, %p1280_p10 }
  0x1e   : > { %1288 = shalt.err (!%p1285_p12)
}
  0x1f   : > { %s1289_s13 = scalar_lea.vmem %s1580_s14, 1024  ;;  %p1297_p5 = scmp.lt.s32.totalorder %s1580_s14, %s1580_s14 }
  0x20   : > { %p1290_p13 = scmp.ne.s32.totalorder %s1580_s14, %s1289_s13  ;;  %p1298_p4 = scmp.lt.s32.totalorder %s1289_s13, %s1289_s13 }
  0x22   : > { %p1292_p0 = pnand %p1290_p13, %p1607_p8  ;;  %p1299_p7 = por %p1298_p4, %p1297_p5 }
  0x24   : > { %p1293_p2 = pneg %p1292_p0 }
  0x26   : > { %p1300_p9 = pnand %p1299_p7, %p1293_p2 }
  0x28   : > { %1303 = shalt.err (!%p1300_p9)
}
  0x29   : > { %s1497_s17 = smov 64   ;;  %s1498_s20 = smov 4  }
  0x2a   : > { %1176 = dma.hbm_to_vmem [thread:$0]  (!%p1591_p6), %s1920_s1, 1024, %s1580_s14, [#allocation6], %s1497_s17, %s1497_s17, %s1498_s20  }
  0x2b   : > { %s1304_s26 = scalar_lea.hbm %s1907_s5, 1024 }
  0x2c   : > { %p1305_p4 = scmp.ne.s32.totalorder %s1907_s5, %s1304_s26  ;;  %p1311_p12 = scmp.lt.u32.totalorder %s1304_s26, %s1907_s5 }
  0x2e   : > { %p1307_p10 = pnand %p1305_p4, %p1607_p8 }
  0x30   : > { %p1308_p11 = pneg %p1307_p10 }
  0x32   : > { %p1313_p13 = pnand %p1311_p12, %p1308_p11 }
  0x34   : > { %1316 = shalt.err (!%p1313_p13)
}
  0x35   : > { %s1317_s14 = scalar_lea.vmem %s1595_s18, 1024  ;;  %p1325_p7 = scmp.lt.s32.totalorder %s1595_s18, %s1595_s18 }
  0x36   : > { %p1318_p0 = scmp.ne.s32.totalorder %s1595_s18, %s1317_s14  ;;  %p1326_p9 = scmp.lt.s32.totalorder %s1317_s14, %s1317_s14 }
  0x38   : > { %p1320_p2 = pnand %p1318_p0, %p1607_p8  ;;  %p1327_p4 = por %p1326_p9, %p1325_p7 }
  0x3a   : > { %p1321_p5 = pneg %p1320_p2 }
  0x3c   : > { %p1328_p10 = pnand %p1327_p4, %p1321_p5 }
  0x3e   : > { %1331 = shalt.err (!%p1328_p10)
}
  0x3f   : > { %1182 = dma.hbm_to_vmem [thread:$0]  (!%p1591_p6), %s1907_s5, 1024, %s1595_s18, [#allocation9], %s1497_s17, %s1497_s17, %s1498_s20  }
  0x40   : > { %s1332_s25 = scalar_lea.hbm %s1905_s3, 1024 }
  0x41   : > { %p1333_p11 = scmp.ne.s32.totalorder %s1905_s3, %s1332_s25  ;;  %p1339_p0 = scmp.lt.u32.totalorder %s1332_s25, %s1905_s3 }
  0x43   : > { %p1335_p12 = pnand %p1333_p11, %p1607_p8 }
  0x45   : > { %p1336_p13 = pneg %p1335_p12 }
  0x47   : > { %p1341_p2 = pnand %p1339_p0, %p1336_p13 }
  0x49   : > { %1344 = shalt.err (!%p1341_p2)
}
  0x4a   : > { %s1345_s18 = scalar_lea.vmem %s1597_s21, 1024  ;;  %p1353_p4 = scmp.lt.s32.totalorder %s1597_s21, %s1597_s21 }
  0x4b   : > { %p1346_p5 = scmp.ne.s32.totalorder %s1597_s21, %s1345_s18  ;;  %p1354_p10 = scmp.lt.s32.totalorder %s1345_s18, %s1345_s18 }
  0x4d   : > { %p1348_p7 = pnand %p1346_p5, %p1607_p8  ;;  %p1355_p11 = por %p1354_p10, %p1353_p4 }
  0x4f   : > { %p1349_p9 = pneg %p1348_p7 }
  0x51   : > { %p1356_p12 = pnand %p1355_p11, %p1349_p9 }
  0x53   : > { %1359 = shalt.err (!%p1356_p12)
}
  0x54   : > { %1179 = dma.hbm_to_vmem [thread:$0]  (!%p1591_p6), %s1905_s3, 1024, %s1597_s21, [#allocation6], %s1497_s17, %s1497_s17, %s1498_s20  }
  0x55   : > { %s1499_s22 = smov [#allocation10]   ;;  %s1360_s26 = scalar_lea.hbm %s1909_s7, 1024 }
  0x56   : > { %s312_s23 = sshll.u32 %s1499_s22, 4  ;;  %p1361_p13 = scmp.ne.s32.totalorder %s1909_s7, %s1360_s26  ;;  %s313_s23 = int_to_ptr.vmem [resolvable:$true] %s312_s23 }
  0x57   : > { %p1367_p5 = scmp.lt.u32.totalorder %s1360_s26, %s1909_s7 }
  0x58   : > { %p1363_p0 = pnand %p1361_p13, %p1607_p8 }
  0x5a   : > { %p1364_p2 = pneg %p1363_p0 }
  0x5c   : > { %p1369_p7 = pnand %p1367_p5, %p1364_p2 }
  0x5e   : > { %1372 = shalt.err (!%p1369_p7)
}
  0x5f   : > { %s1373_s21 = scalar_lea.vmem %s313_s23, 1024  ;;  %p1381_p11 = scmp.lt.s32.totalorder %s313_s23, %s313_s23 }
  0x60   : > { %p1374_p9 = scmp.ne.s32.totalorder %s313_s23, %s1373_s21  ;;  %p1382_p12 = scmp.lt.s32.totalorder %s1373_s21, %s1373_s21 }
  0x62   : > { %p1376_p4 = pnand %p1374_p9, %p1607_p8  ;;  %p1383_p1 = por %p1382_p12, %p1381_p11 }
  0x64   : > { %p1377_p10 = pneg %p1376_p4 }
  0x66   : > { %p1384_p3 = pnand %p1383_p1, %p1377_p10 }
  0x68   : > { %1387 = shalt.err (!%p1384_p3)
}
  0x69   : > { %1185 = dma.hbm_to_vmem [thread:$0]  (!%p1591_p6), %s1909_s7, 1024, %s313_s23, [#allocation9], %s1497_s17, %s1497_s17, %s1498_s20  }
  0x6a   : > { %s981_s19 = sadd.s32 4294967294, %s1492_s12   ;;  %s1706_s27 = sadd.s32 1, %s1492_s12  }
  0x6b   : > { %s31_s22 = ssub.s32 %s1492_s12, %s1706_s27  ;;  %s34_s24 = sadd.s32 1, %s1488_s11 }
  0x6c   : > { %p32_p1 = scmp.eq.s32.totalorder %s31_s22, 0  ;;  %p41_p3 = scmp.ne.s32.totalorder %s1488_s11, %s1484_s10 }
  0x6d   : > { %p42_p8 = scmp.eq.s32.totalorder %s1492_s12, 0  ;;  %p47_p13 = scmp.ne.s32.totalorder %s1484_s10, %s1480_s30 }
  0x6e   : > { %s1717_s25 = scalar_select %p32_p1, %s1488_s11, %s34_s24  }
  0x6f   : > { %p1719_p0 = por %p42_p8, %p41_p3  ;;  %p1923_p2 = scmp.eq.s32.totalorder %s1575_s15, 0 }
  0x70   : > { %p239_p5 = scmp.eq.s32.totalorder %s1575_s15, 1  ;;  %p245_p7 = scmp.eq.s32.totalorder %s981_s19, 1 }
  0x71   : > { %p1725_p6 = por %p1923_p2, %p47_p13  ;;  %p1198_p9 = scmp.lt.s32.totalorder %s1492_s12, 2 }
  0x72   : > { %s329_s20 = sand.u32 1, %s1488_s11   ;;  %p1732_p4 = por %p239_p5, %p41_p3 }
  0x73   : > { %p1736_p10 = por %p245_p7, %p47_p13  ;;  %s988_s29 = sshll.u32 %s329_s20, 2 }
  0x74   : > { %s1925_s23 = scalar_select %p1732_p4, 1, 0 }
  0x75   : > { %s1926_s28 = scalar_select %p1736_p10, 1, 0 }
  0x76   : > { %s989_s13 = sshll.u32 %s1492_s12, 6  ;;  %s333_s9 = scalar_lea.vmem [#allocation2], %s988_s29 }
  0x77   : > { %s1744_s14 = scalar_lea.hbm %s1902_s0, %s989_s13  ;;  %s340_s19 = sshll.u32 %s333_s9, 4  ;;  %s1746_s19 = int_to_ptr.vmem [resolvable:$true] %s340_s19 }
  0x78   : > { %p1750_p11 = pnand %p1198_p9, %p1719_p0  ;;  %s330_s24 = scalar_lea.sflag [#allocation3], %s329_s20 }
  0x79   : > { %s1388_s1 = scalar_lea.hbm %s1744_s14, 64  ;;  %s1393_s18 = scalar_lea.hbm %s1902_s0, 128 }
  0x7a   : > { %p1389_p12 = scmp.ne.s32.totalorder %s1744_s14, %s1388_s1  ;;  %p1390_p1 = pneg %p1750_p11 }
  0x7b   : > { %p1394_p13 = scmp.lt.u32.totalorder %s1744_s14, %s1902_s0  ;;  %p1395_p0 = scmp.lt.u32.totalorder %s1393_s18, %s1388_s1 }
  0x7c   : > { %p1391_p3 = pnand %p1390_p1, %p1389_p12  ;;  %p1397_p5 = scmp.lt.u32.totalorder %s1388_s1, %s1744_s14 }
  0x7d   : > { %p1396_p2 = por %p1395_p0, %p1394_p13 }
  0x7e   : > { %p1392_p8 = pneg %p1391_p3 }
  0x7f   : > { %p1398_p7 = por %p1397_p5, %p1396_p2 }
  0x81   : > { %p1399_p9 = pnand %p1398_p7, %p1392_p8 }
  0x83   : > { %1402 = shalt.err (!%p1399_p9)
}
  0x84   : > { %s1403_s20 = scalar_lea.vmem %s1746_s19, 64  ;;  %s1500_s9 = smov [#allocation2]  }
  0x85   : > { %p1404_p12 = scmp.ne.s32.totalorder %s1746_s19, %s1403_s20  ;;  %s1408_s29 = sshll.u32 %s1500_s9, 4  ;;  %s1409_s29 = int_to_ptr.vmem [resolvable:$false] %s1408_s29 }
  0x86   : > { %s1410_s13 = scalar_lea.vmem %s1409_s29, 128  ;;  %p1411_p4 = scmp.lt.s32.totalorder %s1746_s19, %s1409_s29 }
  0x87   : > { %p1406_p3 = pnand %p1404_p12, %p1390_p1  ;;  %p1412_p13 = scmp.lt.s32.totalorder %s1410_s13, %s1403_s20 }
  0x89   : > { %p1407_p10 = pneg %p1406_p3  ;;  %p1413_p0 = por %p1412_p13, %p1411_p4 }
  0x8b   : > { %p1414_p2 = pnand %p1413_p0, %p1407_p10 }
  0x8d   : > { %1417 = shalt.err (!%p1414_p2)
}
  0x8e   : > { %1189 = dma.hbm_to_vmem [thread:$0]  (!%p1750_p11), %s1744_s14, 64, %s1746_s19, %s330_s24  }
  0x8f   : > { %p1928_p8 = scmp.ne.s32.totalorder %s1918_s16, 0 }
  0x90   : > { %s1782_s1 = sand.u32 (!%p1928_p8), 1, %s1484_s10  }
  0x91   : > { %349 = sbr.rel (%p1928_p8) target bundleno = 1075 (0x433), region = 56  ;;  %s991_s18 = sshll.u32 (!%p1928_p8), %s1782_s1, 2 }
  0x92   : > { %s352_s26 = scalar_lea.sflag (!%p1928_p8), [#allocation3], %s1782_s1  ;;  %s1786_s21 = scalar_lea.vmem (!%p1928_p8), [#allocation2], %s991_s18 }
  0x98   : > { %1463 = dma.done.wait (%p1725_p6), %s352_s26, 64  }
  0x99   : > { %1465 = vsyncadd (%p1725_p6), %s352_s26, 4294967232  ;;  %p1929_p4 = scmp.eq.s32.totalorder %s1575_s15, 0 }
  0x9b   : > { %1467 = dma.done.wait (%p1929_p4), [#allocation6], 2048   ;;  %p1930_p10 = pmov %p1929_p4 }
  0x9c   : > { %p1931_p11 = pmov %p1929_p4 }
  0x9d   : > { %1469 = vsyncadd (%p1930_p10), [#allocation6], 4294965248 }
  0x9e   : > { %1471 = dma.done.wait (%p1931_p11), [#allocation9], 2048   ;;  %p1932_p1 = pmov %p1929_p4 }
  0x9f   : > { %v1501_v0 = vmov 0.0   ;;  %vm1502_vm0 = vmmov 0   ;;  %v1244_v1 = vld [vmem:[#allocation5] sm:$0xff]   ;;  %v1245_v2 = vld [vmem:[#allocation5 + $0x8] sm:$0xff]   ;;  %v1246_v3 = vld [vmem:[#allocation5 + $0x10] sm:$0xff]   ;;  %s996_s20 = sshll.u32 %s1782_s1, 3 }
  0xa0   : > { %1473 = vsyncadd (%p1932_p1), [#allocation9], 4294965248  ;;  %1073 = vmatprep.subr.bf16.mxu0 %v1501_v0  ;;  %1089 = vmatprep.mubr.msk.bf16.mxu0 %vm1502_vm0, %v1501_v0  ;;  %v1252_v4 = vld [vmem:[#allocation7] sm:$0xff]   ;;  %v1247_v5 = vld [vmem:[#allocation5 + $0x18] sm:$0xff]   ;;  %s1034_s13 = sshll.u32 %s1575_s15, 7  ;;  %s405_s18 = scalar_lea.vmem [#allocation11], %s996_s20 }
  0xa1   : > { %1093 = vmatprep.subr.bf16.mxu1 %v1501_v0  ;;  %1109 = vmatprep.mubr.msk.bf16.mxu1 %vm1502_vm0, %v1501_v0  ;;  %v1253_v6 = vld [vmem:[#allocation7 + $0x8] sm:$0xff]   ;;  %v1248_v7 = vld [vmem:[#allocation5 + $0x20] sm:$0xff]   ;;  %v1254_v8 = vld [vmem:[#allocation7 + $0x10] sm:$0xff]   ;;  %s873_s26 = sshll.u32 %s405_s18, 4  ;;  %s1933_s17 = sld [smem:[#allocation17_spill]]  ;;  %s1860_s26 = int_to_ptr.vmem [resolvable:$true] %s873_s26 }
  0xa2   : > { %1074 = vmatpush3.bf16.msra.mxu0 %v1244_v1  ;;  %1094 = vmatpush3.bf16.msra.mxu1 %v1252_v4  ;;  %v1249_v9 = vld [vmem:[#allocation5 + $0x28] sm:$0xff]   ;;  %v1255_v10 = vld [vmem:[#allocation7 + $0x18] sm:$0xff]   ;;  %v1250_v11 = vld [vmem:[#allocation5 + $0x30] sm:$0xff]   ;;  %s860_s19 = scalar_lea.sflag [#allocation4], %s1782_s1  ;;  %s1418_s15 = scalar_lea.vmem %s1860_s26, 128 }
  0xa3   : > { %1075 = vmatprep.subr.bf16.mxu0 %v1501_v0  ;;  %1095 = vmatprep.subr.bf16.mxu1 %v1501_v0  ;;  %v1256_v12 = vld [vmem:[#allocation7 + $0x20] sm:$0xff]   ;;  %v1251_v13 = vld [vmem:[#allocation5 + $0x38] sm:$0xff]   ;;  %v1257_v14 = vld [vmem:[#allocation7 + $0x28] sm:$0xff]   ;;  %p1419_p6 = scmp.ne.s32.totalorder %s1860_s26, %s1418_s15  ;;  %p1934_p5 = scmp.ne.s32.totalorder %s1925_s23, 0 }
  0xa4   : > { %v407_v15 = vld [vmem:[%s1786_s21] sm:$0xf]  ;;  %v1258_v16 = vld [vmem:[#allocation7 + $0x30] sm:$0xff]   ;;  %v1260_v18 = vld [vmem:[#allocation8] sm:$0xff]   ;;  %s1503_s22 = smov [#allocation11]  }
  0xa5   : > { %v1259_v17 = vld [vmem:[#allocation7 + $0x38] sm:$0xff]   ;;  %v1261_v19 = vld [vmem:[#allocation8 + $0x8] sm:$0xff]   ;;  %v1262_v20 = vld [vmem:[#allocation8 + $0x10] sm:$0xff]   ;;  %p1420_p7 = pnand %p1419_p6, %p1934_p5  ;;  %s1422_s24 = sshll.u32 %s1503_s22, 4  ;;  %s1423_s24 = int_to_ptr.vmem [resolvable:$false] %s1422_s24 }
  0xa6   : > { %1076 = vmatpush3.bf16.msra.mxu0 %v1245_v2  ;;  %1096 = vmatpush3.bf16.msra.mxu1 %v1253_v6  ;;  %v1263_v21 = vld [vmem:[#allocation8 + $0x18] sm:$0xff]   ;;  %v1264_v22 = vld [vmem:[#allocation8 + $0x20] sm:$0xff]   ;;  %v1265_v23 = vld [vmem:[#allocation8 + $0x28] sm:$0xff]   ;;  %s1424_s20 = scalar_lea.vmem %s1423_s24, 256  ;;  %p1425_p12 = scmp.lt.s32.totalorder %s1860_s26, %s1423_s24 }
  0xa7   : > { %1077 = vmatprep.subr.bf16.mxu0 %v1501_v0  ;;  %1097 = vmatprep.subr.bf16.mxu1 %v1501_v0  ;;  %v997_v24 = vld [vmem:[%s1904_s2] ss:$0 sm:$0xff]  ;;  %v1266_v32 = vld [vmem:[#allocation8 + $0x30] sm:$0xff]   ;;  %v1268_v34 = vld [vmem:[#allocation10] sm:$0xff]   ;;  %s1858_s14 = scalar_lea.hbm %s1933_s17, %s1034_s13  ;;  %p1421_p9 = pneg %p1420_p7 }
  0xa8   : > { %v1267_v33 = vld [vmem:[#allocation8 + $0x38] sm:$0xff]   ;;  %v1269_v35 = vld [vmem:[#allocation10 + $0x8] sm:$0xff]   ;;  %v1270_v36 = vld [vmem:[#allocation10 + $0x10] sm:$0xff]   ;;  %p1426_p3 = scmp.lt.s32.totalorder %s1424_s20, %s1418_s15 }
  0xa9   : > { %v1271_v37 = vld [vmem:[#allocation10 + $0x18] sm:$0xff]   ;;  %v1272_v38 = vld [vmem:[#allocation10 + $0x20] sm:$0xff]   ;;  %v1273_v39 = vld [vmem:[#allocation10 + $0x28] sm:$0xff]  }
  0xaa   : > { %1078 = vmatpush3.bf16.msra.mxu0 %v1246_v3  ;;  %1098 = vmatpush3.bf16.msra.mxu1 %v1254_v8  ;;  %v1006_v40 = vld [vmem:[%s1906_s4] ss:$0 sm:$0xff]  ;;  %v1274_v48 = vld [vmem:[#allocation10 + $0x30] sm:$0xff]   ;;  %p1427_p13 = por %p1426_p3, %p1425_p12 }
  0xab   : > { %1079 = vmatprep.subr.bf16.mxu0 %v1501_v0  ;;  %1099 = vmatprep.subr.bf16.mxu1 %v1501_v0  ;;  %v1275_v49 = vld [vmem:[#allocation10 + $0x38] sm:$0xff]  }
  0xac   : > { %v1015_v50 = vld [vmem:[%s1908_s6] ss:$0 sm:$0xff]  ;;  %p1428_p0 = pnand %p1427_p13, %p1421_p9 }
  0xad   : > { %v1024_v58 = vld [vmem:[%s1910_s8] ss:$0 sm:$0xff] }
  0xae   : > { %1080 = vmatpush3.bf16.msra.mxu0 %v1247_v5  ;;  %1100 = vmatpush3.bf16.msra.mxu1 %v1255_v10 }
  0xaf   : > { %1081 = vmatprep.subr.bf16.mxu0 %v1501_v0  ;;  %1101 = vmatprep.subr.bf16.mxu1 %v1501_v0 }
  0xb2   : > { %1082 = vmatpush3.bf16.msra.mxu0 %v1248_v7  ;;  %1102 = vmatpush3.bf16.msra.mxu1 %v1256_v12 }
  0xb3   : > { %1083 = vmatprep.subr.bf16.mxu0 %v1501_v0  ;;  %1103 = vmatprep.subr.bf16.mxu1 %v1501_v0 }
  0xb6   : > { %1084 = vmatpush3.bf16.msra.mxu0 %v1249_v9  ;;  %1104 = vmatpush3.bf16.msra.mxu1 %v1257_v14 }
  0xb7   : > { %1085 = vmatprep.subr.bf16.mxu0 %v1501_v0  ;;  %1105 = vmatprep.subr.bf16.mxu1 %v1501_v0 }
  0xba   : > { %1086 = vmatpush3.bf16.msra.mxu0 %v1250_v11  ;;  %1106 = vmatpush3.bf16.msra.mxu1 %v1258_v16 }
  0xbb   : > { %1087 = vmatprep.subr.bf16.mxu0 %v1501_v0  ;;  %1107 = vmatprep.subr.bf16.mxu1 %v1501_v0 }
  0xbe   : > { %1088 = vmatpush3.bf16.msra.mxu0 %v1251_v13  ;;  %1108 = vmatpush3.bf16.msra.mxu1 %v1259_v17 }
  0xbf   : > { %1113 = vmatprep.subr.bf16.mxu0 %v1501_v0  ;;  %1133 = vmatprep.subr.bf16.mxu1 %v1501_v0 }
  0xc1   : > { %1090 = vmatmul.mubr.bf16.vlgmr.msra.gmra.mrb[0].mxu0 %v407_v15 }
  0xc2   : > { %1129 = vmatprep.mubr.msk.bf16.mxu0 %vm1502_vm0, %v1501_v0  ;;  %1114 = vmatpush3.bf16.msra.mxu0 %v1260_v18 }
  0xc3   : > { %1115 = vmatprep.subr.bf16.mxu0 %v1501_v0 }
  0xc6   : > { %1116 = vmatpush3.bf16.msra.mxu0 %v1261_v19 }
  0xc7   : > { %1117 = vmatprep.subr.bf16.mxu0 %v1501_v0 }
  0xca   : > { %1118 = vmatpush3.bf16.msra.mxu0 %v1262_v20 }
  0xcb   : > { %1119 = vmatprep.subr.bf16.mxu0 %v1501_v0 }
  0xce   : > { %1120 = vmatpush3.bf16.msra.mxu0 %v1263_v21 }
  0xcf   : > { %1121 = vmatprep.subr.bf16.mxu0 %v1501_v0 }
  0xd2   : > { %1122 = vmatpush3.bf16.msra.mxu0 %v1264_v22 }
  0xd3   : > { %1123 = vmatprep.subr.bf16.mxu0 %v1501_v0 }
  0xd6   : > { %1124 = vmatpush3.bf16.msra.mxu0 %v1265_v23 }
  0xd7   : > { %1125 = vmatprep.subr.bf16.mxu0 %v1501_v0 }
  0xda   : > { %1126 = vmatpush3.bf16.msra.mxu0 %v1266_v32 }
  0xdb   : > { %1127 = vmatprep.subr.bf16.mxu0 %v1501_v0 }
  0xde   : > { %1128 = vmatpush3.bf16.msra.mxu0 %v1267_v33 }
 0x194   : > { %v513_v25 = vpop.f32.mrb[0].mxu0 }
 0x195   : > { %v514_v26 = vadd.f32 %v997_v24, %v513_v25  ;;  %v1091_v27 = vpop.f32.mrb[1].mxu0 }
 0x196   : > { %v516_v28 = vpop.f32.mrb[2].mxu0 }
 0x197   : > { %v519_v29 = vmax.f32 %v514_v26, 0.0  ;;  %v1092_v30 = vpop.f32.mrb[3].mxu0 }
 0x199   : > { %v520_v31 = vpack.c.bf16 %v519_v29, %v519_v29 }
 0x19b   : > { %1110 = vmatmul.mubr.bf16.vlgmr.msra.gmra.mrb[0].mxu1 %v520_v31 }
 0x19c   : > { %1149 = vmatprep.mubr.msk.bf16.mxu1 %vm1502_vm0, %v1501_v0  ;;  %1134 = vmatpush3.bf16.msra.mxu1 %v1268_v34 }
 0x19d   : > { %1135 = vmatprep.subr.bf16.mxu1 %v1501_v0 }
 0x1a0   : > { %1136 = vmatpush3.bf16.msra.mxu1 %v1269_v35 }
 0x1a1   : > { %1137 = vmatprep.subr.bf16.mxu1 %v1501_v0 }
 0x1a4   : > { %1138 = vmatpush3.bf16.msra.mxu1 %v1270_v36 }
 0x1a5   : > { %1139 = vmatprep.subr.bf16.mxu1 %v1501_v0 }
 0x1a8   : > { %1140 = vmatpush3.bf16.msra.mxu1 %v1271_v37 }
 0x1a9   : > { %1141 = vmatprep.subr.bf16.mxu1 %v1501_v0 }
 0x1ac   : > { %1142 = vmatpush3.bf16.msra.mxu1 %v1272_v38 }
 0x1ad   : > { %1143 = vmatprep.subr.bf16.mxu1 %v1501_v0 }
 0x1b0   : > { %1144 = vmatpush3.bf16.msra.mxu1 %v1273_v39 }
 0x1b1   : > { %1145 = vmatprep.subr.bf16.mxu1 %v1501_v0 }
 0x1b4   : > { %1146 = vmatpush3.bf16.msra.mxu1 %v1274_v48 }
 0x1b5   : > { %1147 = vmatprep.subr.bf16.mxu1 %v1501_v0 }
 0x1b8   : > { %1148 = vmatpush3.bf16.msra.mxu1 %v1275_v49 }
 0x26e   : > { %v626_v41 = vpop.f32.mrb[0].mxu1 }
 0x26f   : > { %v627_v42 = vadd.f32 %v1006_v40, %v626_v41  ;;  %v1111_v43 = vpop.f32.mrb[1].mxu1 }
 0x270   : > { %v629_v44 = vpop.f32.mrb[2].mxu1 }
 0x271   : > { %v632_v45 = vmax.f32 %v627_v42, 0.0  ;;  %v1112_v46 = vpop.f32.mrb[3].mxu1 }
 0x273   : > { %v633_v47 = vpack.c.bf16 %v632_v45, %v632_v45 }
 0x275   : > { %1130 = vmatmul.mubr.bf16.vlgmr.msra.gmra.mrb[4].mxu0 %v633_v47 }
 0x348   : > { %v739_v51 = vpop.f32.mrb[4].mxu0 }
 0x349   : > { %v740_v52 = vadd.f32 %v1015_v50, %v739_v51  ;;  %v1131_v53 = vpop.f32.mrb[5].mxu0 }
 0x34a   : > { %v742_v54 = vpop.f32.mrb[6].mxu0 }
 0x34b   : > { %v745_v55 = vmax.f32 %v740_v52, 0.0  ;;  %v1132_v56 = vpop.f32.mrb[7].mxu0 }
 0x34d   : > { %v746_v57 = vpack.c.bf16 %v745_v55, %v745_v55 }
 0x34f   : > { %1150 = vmatmul.mubr.bf16.vlgmr.msra.gmra.mrb[4].mxu1 %v746_v57 }
 0x422   : > { %v852_v59 = vpop.f32.mrb[4].mxu1 }
 0x423   : > { %v853_v60 = vadd.f32 %v1024_v58, %v852_v59  ;;  %v1151_v61 = vpop.f32.mrb[5].mxu1 }
 0x424   : > { %v855_v62 = vpop.f32.mrb[6].mxu1 }
 0x425   : > { %858 = vst [vmem:[%s405_s18] sm:$0xff] %v853_v60  ;;  %v1152_v63 = vpop.f32.mrb[7].mxu1 }
 0x426   : > { %1431 = shalt.err (!%p1428_p0)
}
 0x427   : > { %s1432_s1 = scalar_lea.hbm %s1858_s14, 128  ;;  %s1436_s13 = scalar_lea.hbm %s1933_s17, 256 }
 0x428   : > { %p1433_p2 = scmp.ne.s32.totalorder %s1858_s14, %s1432_s1  ;;  %p1437_p10 = scmp.lt.u32.totalorder %s1858_s14, %s1933_s17 }
 0x429   : > { %p1438_p11 = scmp.lt.u32.totalorder %s1436_s13, %s1432_s1  ;;  %p1440_p6 = scmp.lt.u32.totalorder %s1432_s1, %s1858_s14 }
 0x42a   : > { %p1434_p8 = pnand %p1433_p2, %p1934_p5 }
 0x42b   : > { %p1439_p1 = por %p1438_p11, %p1437_p10 }
 0x42c   : > { %p1435_p4 = pneg %p1434_p8 }
 0x42d   : > { %p1441_p7 = por %p1440_p6, %p1439_p1 }
 0x42f   : > { %p1442_p9 = pnand %p1441_p7, %p1435_p4 }
 0x431   : > { %1445 = shalt.err (!%p1442_p9)
}
 0x432   : > { %1171 = dma.vmem_to_hbm [thread:$0]  (%p1934_p5), %s1860_s26, 128, %s1858_s14, %s860_s19  }
 0x433 PF: > { %s885_s16 = sand.u32 1, %s1480_s30   ;;  %p1935_p12 = scmp.ne.s32.totalorder %s1926_s28, 0 }
 0x434   : > { %p1936_p3 = scmp.ge.s32.totalorder %s1492_s12, 2  ;;  %s886_s15 = scalar_lea.sflag [#allocation4], %s885_s16 }
 0x436   : > { %p1191_p13 = pnand %p1936_p3, %p1935_p12 }
 0x438   : > { %1475 = dma.done.wait (!%p1191_p13), %s886_s15, 128  }
 0x439   : > { %1477 = vsyncadd (!%p1191_p13), %s886_s15, 4294967168  ;;  %p24_p0 = scmp.ge.s32.totalorder %s1706_s27, 4   ;;  %s1937_s30 = smov %s1484_s10 }
 0x43a   : > { %s1938_s10 = smov %s1488_s11  ;;  %s1939_s11 = smov %s1717_s25 }
 0x43b   : > { %s1940_s12 = smov %s1706_s27  ;;  %26 = sbr.rel (!%p24_p0) target bundleno = 10 (0xa), region = 117 }
 0x442   :  { %891 = vsyncpa [#allocation3], 1 }
 0x443   :  { %893 = vsyncpa [#allocation3 + $0x1], 1 }
 0x444   :  { %894 = vsyncpa [#allocation6], 1 }
 0x445   :  { %895 = vsyncpa [#allocation9], 1 }
 0x446   :  { %896 = vsyncpa [#allocation4], 1 }
 0x447   :  { %898 = vsyncpa [#allocation4 + $0x1], 1 }

</bundles_post_ra>
